<compile_context>
chip_gen: v7x
topology: tpu7x:2x2x1
jax: 0.10.0
libtpu: 0.0.40
codegen_flags: <defaults>
</compile_context>

<pallas_src>
import jax
import jax.numpy as jnp
import numpy as np
from jax.experimental import pallas as pl
from jax.experimental.pallas import tpu as pltpu


_SEQ_TILE_TARGET = 512          # rows per output tile (multiple of 8)
_ROWS_IN_FLIGHT_TARGET = 128    # target in-flight gather DMAs per stream
_VMEM_BUDGET_BYTES = 48 * 1024 * 1024   # fits v7x's 64 MiB/TC with headroom
_ROW_UNROLL = 8                 # manual unroll of the DMA issue/wait loops


def _round_up(x, m):
    return ((x + m - 1) // m) * m


def _choose_tiling(batch, seqlen, embed_dim, itemsize, seq_tile=None):
    """Pick (seq_tile, padded_seqlen, chunk, lookahead)."""
    if seq_tile is not None:
        assert seq_tile > 0 and seq_tile % 8 == 0, "seq_tile must be a positive multiple of 8"
        tt = seq_tile
    else:
        tt = min(_SEQ_TILE_TARGET, _round_up(seqlen, 8))
        # VMEM footprint guard: ~2x out block + 2x pos block + 2x stage = 6 tiles.
        while tt > 8 and 6 * tt * embed_dim * itemsize > _VMEM_BUDGET_BYTES - (8 << 20):
            tt = max(8, _round_up(tt // 2, 8))
    padded = _round_up(seqlen, tt)
    # v7x has 2 TensorCores per chip: keep >= 2 grid steps so both get work
    # (neutral on single-core v5e/v6e).
    if batch == 1 and padded // tt == 1 and tt >= 16 and tt % 16 == 0:
        tt //= 2
    # Sub-chunk = compute/store granularity inside a tile (multiple of 8).
    chunk = next(c for c in (64, 32, 16, 8) if tt % c == 0)
    n_chunks = tt // chunk
    lookahead = max(1, min(n_chunks, _ROWS_IN_FLIGHT_TARGET // chunk))
    return tt, padded, chunk, lookahead


def _run_chunked_gather(n_chunks, chunk, lookahead, issue_row, wait_row, emit_chunk):
    """Chunked, overlapped row-gather pipeline over one output tile.

    issue_row(j) / wait_row(j): start / complete the DMA(s) for tile row j.
    emit_chunk(c): combine + store rows [c*chunk, (c+1)*chunk) — runs while the
    DMAs of chunk c+lookahead are in flight.
    """
    unroll = min(_ROW_UNROLL, chunk)
    groups = chunk // unroll      # chunk and unroll are powers of two >= 8

    def _issue_chunk(c):
        @pl.loop(c * groups, (c + 1) * groups)
        def _(g):
            j0 = g * unroll
            for r in range(unroll):          # manual unroll: back-to-back descriptors
                issue_row(j0 + r)

    def _wait_chunk(c):
        @pl.loop(c * groups, (c + 1) * groups)
        def _(g):
            j0 = g * unroll
            for r in range(unroll):
                wait_row(j0 + r)

    for c in range(lookahead):               # prologue: fill the DMA window
        _issue_chunk(c)
    for c in range(n_chunks):                # steady state + drain
        _wait_chunk(c)
        if c + lookahead < n_chunks:         # refill the window
            _issue_chunk(c + lookahead)
        emit_chunk(c)                        # overlaps the in-flight DMAs


def _make_word_only_kernel(tt, flat_seqlen, chunk, lookahead):
    # max_position_embeddings <= 0 branch: word embeddings only.
    q = chunk * lookahead
    n_chunks = tt // chunk

    def kernel(ids_ref, word_hbm, o_ref, stage_ref, sem):
        s = pl.program_id(0)
        b = pl.program_id(1)
        base = b * flat_seqlen + s * tt      # flat index of this tile's first row

        def issue_row(j):
            row = ids_ref[base + j]
            pltpu.make_async_copy(word_hbm.at[row], stage_ref.at[j],
                                  sem.at[j % q]).start()

        def wait_row(j):
            pltpu.make_async_copy(word_hbm.at[0], stage_ref.at[j],
                                  sem.at[j % q]).wait()

        def emit_chunk(c):
            sl = pl.ds(c * chunk, chunk)
            o_ref[0, sl, :] = stage_ref[sl, :].astype(o_ref.dtype)

        _run_chunked_gather(n_chunks, chunk, lookahead, issue_row, wait_row, emit_chunk)

    return kernel


def _make_pos_block_kernel(tt, flat_seqlen, chunk, lookahead):
    # position_ids is None (arange): pos tile arrives via a contiguous BlockSpec.
    q = chunk * lookahead
    n_chunks = tt // chunk

    def kernel(ids_ref, word_hbm, pos_ref, o_ref, stage_ref, sem):
        s = pl.program_id(0)
        b = pl.program_id(1)
        base = b * flat_seqlen + s * tt

        def issue_row(j):
            row = ids_ref[base + j]
            pltpu.make_async_copy(word_hbm.at[row], stage_ref.at[j],
                                  sem.at[j % q]).start()

        def wait_row(j):
            pltpu.make_async_copy(word_hbm.at[0], stage_ref.at[j],
                                  sem.at[j % q]).wait()

        def emit_chunk(c):
            sl = pl.ds(c * chunk, chunk)
            o_ref[0, sl, :] = (stage_ref[sl, :] + pos_ref[sl, :]).astype(o_ref.dtype)

        _run_chunked_gather(n_chunks, chunk, lookahead, issue_row, wait_row, emit_chunk)

    return kernel


def _make_gather_both_kernel(tt, flat_seqlen, chunk, lookahead):
    # Explicit position_ids: gather both tables, word & pos streams interleaved.
    q = chunk * lookahead
    n_chunks = tt // chunk

    def kernel(ids_ref, pos_ids_ref, word_hbm, pos_hbm, o_ref,
               stage_w, stage_p, sem_w, sem_p):
        s = pl.program_id(0)
        b = pl.program_id(1)
        base = b * flat_seqlen + s * tt

        def issue_row(j):
            wrow = ids_ref[base + j]
            prow = pos_ids_ref[base + j]
            pltpu.make_async_copy(word_hbm.at[wrow], stage_w.at[j],
                                  sem_w.at[j % q]).start()
            pltpu.make_async_copy(pos_hbm.at[prow], stage_p.at[j],
                                  sem_p.at[j % q]).start()

        def wait_row(j):
            pltpu.make_async_copy(word_hbm.at[0], stage_w.at[j],
                                  sem_w.at[j % q]).wait()
            pltpu.make_async_copy(pos_hbm.at[0], stage_p.at[j],
                                  sem_p.at[j % q]).wait()

        def emit_chunk(c):
            sl = pl.ds(c * chunk, chunk)
            o_ref[0, sl, :] = (stage_w[sl, :] + stage_p[sl, :]).astype(o_ref.dtype)

        _run_chunked_gather(n_chunks, chunk, lookahead, issue_row, wait_row, emit_chunk)

    return kernel


def gpt2_embeddings_fwd(input_ids, word_table, pos_table=None, position_ids=None,
                        *, seq_tile=None):
    """Pallas equivalent of GPT2Embeddings.forward (word_embed_proj_dim=None)."""
    batch, seqlen = input_ids.shape
    vocab_size, embed_dim = word_table.shape
    out_dtype = word_table.dtype
    itemsize = jnp.dtype(word_table.dtype).itemsize

    tt, padded, chunk, lookahead = _choose_tiling(batch, seqlen, embed_dim,
                                                  itemsize, seq_tile)
    q_rows = chunk * lookahead
    n_seq_tiles = padded // tt
    pad = padded - seqlen
    grid = (n_seq_tiles, batch)   # batch innermost -> pos block reused across batch

    # PyTorch raises on out-of-range ids; clamp so the data-dependent DMA can
    # never address outside the table.
    # TODO(synk): surface out-of-range token ids as an error instead of clamping.
    ids = jnp.clip(input_ids.astype(jnp.int32), 0, vocab_size - 1)
    if pad:
        ids = jnp.pad(ids, ((0, 0), (0, pad)))       # id 0 is always valid
    ids_flat = ids.reshape(-1)                       # 1-D: avoids 2-D SMEM padding

    out_shape = jax.ShapeDtypeStruct((batch, padded, embed_dim), out_dtype)
    cparams = pltpu.CompilerParams(
        dimension_semantics=("parallel", "parallel"),
        vmem_limit_bytes=_VMEM_BUDGET_BYTES,
    )

    def _finish(out):
        return out[:, :seqlen, :] if pad else out

    if pos_table is None:
        grid_spec = pltpu.PrefetchScalarGridSpec(
            num_scalar_prefetch=1,
            grid=grid,
            in_specs=[pl.BlockSpec(memory_space=pl.ANY)],            # word table (HBM)
            out_specs=pl.BlockSpec((1, tt, embed_dim),
                                   lambda s, b, ids: (b, s, 0)),
            scratch_shapes=[
                pltpu.VMEM((tt, embed_dim), word_table.dtype),
                pltpu.SemaphoreType.DMA((q_rows,)),
            ],
        )
        out = pl.pallas_call(
            _make_word_only_kernel(tt, padded, chunk, lookahead),
            out_shape=out_shape, grid_spec=grid_spec, compiler_params=cparams,
        )(ids_flat, word_table)
        return _finish(out)

    max_pos, pos_dim = pos_table.shape
    assert pos_dim == embed_dim

    if position_ids is None and seqlen <= max_pos:
        # Default arange positions: read the pos table as contiguous tiles.
        pos_tab = pos_table
        if padded > max_pos:
            # Padded tail positions are sliced off afterwards; zero rows are fine.
            pos_tab = jnp.pad(pos_table, ((0, padded - max_pos), (0, 0)))
        grid_spec = pltpu.PrefetchScalarGridSpec(
            num_scalar_prefetch=1,
            grid=grid,
            in_specs=[
                pl.BlockSpec(memory_space=pl.ANY),                    # word table (HBM)
                pl.BlockSpec((tt, embed_dim),
                             lambda s, b, ids: (s, 0)),               # contiguous pos tile
            ],
            out_specs=pl.BlockSpec((1, tt, embed_dim),
                                   lambda s, b, ids: (b, s, 0)),
            scratch_shapes=[
                pltpu.VMEM((tt, embed_dim), word_table.dtype),
                pltpu.SemaphoreType.DMA((q_rows,)),
            ],
        )
        out = pl.pallas_call(
            _make_pos_block_kernel(tt, padded, chunk, lookahead),
            out_shape=out_shape, grid_spec=grid_spec, compiler_params=cparams,
        )(ids_flat, word_table, pos_tab)
        return _finish(out)

    # General path: explicit (possibly non-arange) position_ids.
    if position_ids is None:
        # seqlen > max_position_embeddings: PyTorch nn.Embedding would raise.
        # TODO(synk): surface out-of-range positions as an error instead of clamping.
        position_ids = jnp.broadcast_to(
            jnp.arange(seqlen, dtype=jnp.int32)[None, :], (batch, seqlen)
        )
    pos_ids = jnp.clip(position_ids.astype(jnp.int32), 0, max_pos - 1)
    if pad:
        pos_ids = jnp.pad(pos_ids, ((0, 0), (0, pad)))
    pos_ids_flat = pos_ids.reshape(-1)

    grid_spec = pltpu.PrefetchScalarGridSpec(
        num_scalar_prefetch=2,
        grid=grid,
        in_specs=[
            pl.BlockSpec(memory_space=pl.ANY),   # word table (HBM)
            pl.BlockSpec(memory_space=pl.ANY),   # pos table (HBM)
        ],
        out_specs=pl.BlockSpec((1, tt, embed_dim),
                               lambda s, b, ids, pos: (b, s, 0)),
        scratch_shapes=[
            pltpu.VMEM((tt, embed_dim), word_table.dtype),
            pltpu.VMEM((tt, embed_dim), pos_table.dtype),
            pltpu.SemaphoreType.DMA((q_rows,)),
            pltpu.SemaphoreType.DMA((q_rows,)),
        ],
    )
    out = pl.pallas_call(
        _make_gather_both_kernel(tt, padded, chunk, lookahead),
        out_shape=out_shape, grid_spec=grid_spec, compiler_params=cparams,
    )(ids_flat, pos_ids_flat, word_table, pos_table)
    return _finish(out)


if __name__ == "__main__":
    # Small config consistent with GPT2Embeddings.__init__.
    embed_dim = 32
    vocab_size = 64
    max_position_embeddings = 16
    batch, seqlen = 2, 8

    key = jax.random.PRNGKey(0)
    k_w, k_p, k_ids, k_pos, k_ids2 = jax.random.split(key, 5)

    word_table = jax.random.normal(k_w, (vocab_size, embed_dim), dtype=jnp.float32)
    pos_table = jax.random.normal(
        k_p, (max_position_embeddings, embed_dim), dtype=jnp.float32
    )
    input_ids = jax.random.randint(
        k_ids, (batch, seqlen), minval=0, maxval=vocab_size, dtype=jnp.int32
    )

    # 1) Default path: position_ids=None (arange), contiguous pos tiles.
    out = jax.block_until_ready(gpt2_embeddings_fwd(input_ids, word_table, pos_table))
    ref = word_table[input_ids] + pos_table[jnp.arange(seqlen)][None, :, :]
    np.testing.assert_allclose(np.asarray(out), np.asarray(ref), rtol=1e-6, atol=1e-6)
    assert out.shape == (batch, seqlen, embed_dim)
    assert out.dtype == jnp.float32

    # 2) Explicit position_ids path (interleaved gather of both tables).
    pos_ids = jax.random.randint(
        k_pos, (batch, seqlen), minval=0, maxval=max_position_embeddings,
        dtype=jnp.int32,
    )
    out2 = jax.block_until_ready(
        gpt2_embeddings_fwd(input_ids, word_table, pos_table, pos_ids)
    )
    ref2 = word_table[input_ids] + pos_table[pos_ids]
    np.testing.assert_allclose(np.asarray(out2), np.asarray(ref2), rtol=1e-6, atol=1e-6)

    # 3) max_position_embeddings <= 0 path: word embeddings only.
    out3 = jax.block_until_ready(gpt2_embeddings_fwd(input_ids, word_table, None))
    np.testing.assert_allclose(
        np.asarray(out3), np.asarray(word_table[input_ids]), rtol=1e-6, atol=1e-6
    )

    # 4) Non-multiple-of-8 seqlen: exercises the padding (tile-dense) path.
    seqlen_odd = 10
    ids_odd = jax.random.randint(
        k_ids2, (batch, seqlen_odd), minval=0, maxval=vocab_size, dtype=jnp.int32
    )
    out4 = jax.block_until_ready(gpt2_embeddings_fwd(ids_odd, word_table, pos_table))
    ref4 = word_table[ids_odd] + pos_table[jnp.arange(seqlen_odd)][None, :, :]
    np.testing.assert_allclose(np.asarray(out4), np.asarray(ref4), rtol=1e-6, atol=1e-6)
    assert out4.shape == (batch, seqlen_odd, embed_dim)

    print("KERNEL_OK")
</pallas_src>

<mosaic_0001>
module attributes {stable_mosaic.version = 11 : i64} {
  func.func @kernel(%arg0: i32, %arg1: i32, %arg2: memref<16xi32, #tpu.memory_space<smem>>, %arg3: memref<64x32xf32, #tpu.memory_space<any>>, %arg4: memref<8x32xf32, #tpu.memory_space<vmem>>, %arg5: memref<1x8x32xf32, #tpu.memory_space<vmem>>, %arg6: memref<8x32xf32, #tpu.memory_space<vmem>>, %arg7: memref<8x!tpu.dma_semaphore, #tpu.memory_space<semaphore_mem>>) attributes {dimension_semantics = [#tpu.dimension_semantics<parallel>, #tpu.dimension_semantics<parallel>], iteration_bounds = array<i64: 1, 2>, scalar_prefetch = 1 : i64, scratch_operands = 2 : i64, tpu.core_type = #tpu.core_type<tc>, window_params = [{}, {transform_indices = @transform_1, window_bounds = array<i64: 8, 32>}, {transform_indices = @transform_2, window_bounds = array<i64: 1, 8, 32>}]} {
    %c8_i32 = arith.constant 8 : i32
    %0 = arith.muli %arg1, %c8_i32 : i32
    %c8_i32_0 = arith.constant 8 : i32
    %1 = arith.muli %arg0, %c8_i32_0 : i32
    %2 = arith.addi %0, %1 : i32
    %c0_i32 = arith.constant 0 : i32
    %c1_i32 = arith.constant 1 : i32
    %3 = arith.muli %c0_i32, %c1_i32 : i32
    %c0_i32_1 = arith.constant 0 : i32
    %4 = arith.addi %c0_i32_1, %3 : i32
    %c8_i32_2 = arith.constant 8 : i32
    %5 = arith.muli %4, %c8_i32_2 : i32
    %c0_i32_3 = arith.constant 0 : i32
    %6 = arith.addi %5, %c0_i32_3 : i32
    %7 = arith.addi %2, %6 : i32
    %8 = arith.index_cast %7 : i32 to index
    %9 = memref.load %arg2[%8] : memref<16xi32, #tpu.memory_space<smem>>
    %c8_i32_4 = arith.constant 8 : i32
    %c0_i32_5 = arith.constant 0 : i32
    %10 = arith.cmpi eq, %c8_i32_4, %c0_i32_5 : i32
    %c1_i32_6 = arith.constant 1 : i32
    %11 = arith.select %10, %c1_i32_6, %c8_i32_4 : i32
    %12 = arith.remsi %6, %11 : i32
    %c0_i32_7 = arith.constant 0 : i32
    %13 = arith.cmpi ne, %12, %c0_i32_7 : i32
    %c0_i32_8 = arith.constant 0 : i32
    %14 = arith.cmpi slt, %12, %c0_i32_8 : i32
    %c0_i32_9 = arith.constant 0 : i32
    %15 = arith.cmpi slt, %11, %c0_i32_9 : i32
    %16 = arith.xori %14, %15 : i1
    %17 = arith.andi %16, %13 : i1
    %18 = arith.addi %12, %11 : i32
    %19 = arith.select %17, %18, %12 : i32
    %c0_i32_10 = arith.constant 0 : i32
    %20 = tpu.memref_slice %arg3[%9, %c0_i32_10] : memref<64x32xf32, #tpu.memory_space<any>> -> memref<1x32xf32, #tpu.memory_space<any>>
    %21 = tpu.memref_squeeze %20 : memref<1x32xf32, #tpu.memory_space<any>> -> memref<32xf32, #tpu.memory_space<any>>
    %c0_i32_11 = arith.constant 0 : i32
    %22 = tpu.memref_slice %arg6[%6, %c0_i32_11] : memref<8x32xf32, #tpu.memory_space<vmem>> -> memref<1x32xf32, #tpu.memory_space<vmem>>
    %23 = tpu.memref_squeeze %22 : memref<1x32xf32, #tpu.memory_space<vmem>> -> memref<32xf32, #tpu.memory_space<vmem>>
    %24 = tpu.memref_slice %arg7[%19] : memref<8x!tpu.dma_semaphore, #tpu.memory_space<semaphore_mem>> -> memref<1x!tpu.dma_semaphore, #tpu.memory_space<semaphore_mem>>
    %25 = tpu.memref_squeeze %24 : memref<1x!tpu.dma_semaphore, #tpu.memory_space<semaphore_mem>> -> memref<!tpu.dma_semaphore, #tpu.memory_space<semaphore_mem>>
    tpu.enqueue_dma source(%21 : memref<32xf32, #tpu.memory_space<any>>) target(%23 : memref<32xf32, #tpu.memory_space<vmem>>) target_semaphore(%25 : memref<!tpu.dma_semaphore, #tpu.memory_space<semaphore_mem>>)
    %c1_i32_12 = arith.constant 1 : i32
    %26 = arith.addi %5, %c1_i32_12 : i32
    %27 = arith.addi %2, %26 : i32
    %28 = arith.index_cast %27 : i32 to index
    %29 = memref.load %arg2[%28] : memref<16xi32, #tpu.memory_space<smem>>
    %c8_i32_13 = arith.constant 8 : i32
    %c0_i32_14 = arith.constant 0 : i32
    %30 = arith.cmpi eq, %c8_i32_13, %c0_i32_14 : i32
    %c1_i32_15 = arith.constant 1 : i32
    %31 = arith.select %30, %c1_i32_15, %c8_i32_13 : i32
    %32 = arith.remsi %26, %31 : i32
    %c0_i32_16 = arith.constant 0 : i32
    %33 = arith.cmpi ne, %32, %c0_i32_16 : i32
    %c0_i32_17 = arith.constant 0 : i32
    %34 = arith.cmpi slt, %32, %c0_i32_17 : i32
    %c0_i32_18 = arith.constant 0 : i32
    %35 = arith.cmpi slt, %31, %c0_i32_18 : i32
    %36 = arith.xori %34, %35 : i1
    %37 = arith.andi %36, %33 : i1
    %38 = arith.addi %32, %31 : i32
    %39 = arith.select %37, %38, %32 : i32
    %c0_i32_19 = arith.constant 0 : i32
    %40 = tpu.memref_slice %arg3[%29, %c0_i32_19] : memref<64x32xf32, #tpu.memory_space<any>> -> memref<1x32xf32, #tpu.memory_space<any>>
    %41 = tpu.memref_squeeze %40 : memref<1x32xf32, #tpu.memory_space<any>> -> memref<32xf32, #tpu.memory_space<any>>
    %c0_i32_20 = arith.constant 0 : i32
    %42 = tpu.memref_slice %arg6[%26, %c0_i32_20] : memref<8x32xf32, #tpu.memory_space<vmem>> -> memref<1x32xf32, #tpu.memory_space<vmem>>
    %43 = tpu.memref_squeeze %42 : memref<1x32xf32, #tpu.memory_space<vmem>> -> memref<32xf32, #tpu.memory_space<vmem>>
    %44 = tpu.memref_slice %arg7[%39] : memref<8x!tpu.dma_semaphore, #tpu.memory_space<semaphore_mem>> -> memref<1x!tpu.dma_semaphore, #tpu.memory_space<semaphore_mem>>
    %45 = tpu.memref_squeeze %44 : memref<1x!tpu.dma_semaphore, #tpu.memory_space<semaphore_mem>> -> memref<!tpu.dma_semaphore, #tpu.memory_space<semaphore_mem>>
    tpu.enqueue_dma source(%41 : memref<32xf32, #tpu.memory_space<any>>) target(%43 : memref<32xf32, #tpu.memory_space<vmem>>) target_semaphore(%45 : memref<!tpu.dma_semaphore, #tpu.memory_space<semaphore_mem>>)
    %c2_i32 = arith.constant 2 : i32
    %46 = arith.addi %5, %c2_i32 : i32
    %47 = arith.addi %2, %46 : i32
    %48 = arith.index_cast %47 : i32 to index
    %49 = memref.load %arg2[%48] : memref<16xi32, #tpu.memory_space<smem>>
    %c8_i32_21 = arith.constant 8 : i32
    %c0_i32_22 = arith.constant 0 : i32
    %50 = arith.cmpi eq, %c8_i32_21, %c0_i32_22 : i32
    %c1_i32_23 = arith.constant 1 : i32
    %51 = arith.select %50, %c1_i32_23, %c8_i32_21 : i32
    %52 = arith.remsi %46, %51 : i32
    %c0_i32_24 = arith.constant 0 : i32
    %53 = arith.cmpi ne, %52, %c0_i32_24 : i32
    %c0_i32_25 = arith.constant 0 : i32
    %54 = arith.cmpi slt, %52, %c0_i32_25 : i32
    %c0_i32_26 = arith.constant 0 : i32
    %55 = arith.cmpi slt, %51, %c0_i32_26 : i32
    %56 = arith.xori %54, %55 : i1
    %57 = arith.andi %56, %53 : i1
    %58 = arith.addi %52, %51 : i32
    %59 = arith.select %57, %58, %52 : i32
    %c0_i32_27 = arith.constant 0 : i32
    %60 = tpu.memref_slice %arg3[%49, %c0_i32_27] : memref<64x32xf32, #tpu.memory_space<any>> -> memref<1x32xf32, #tpu.memory_space<any>>
    %61 = tpu.memref_squeeze %60 : memref<1x32xf32, #tpu.memory_space<any>> -> memref<32xf32, #tpu.memory_space<any>>
    %c0_i32_28 = arith.constant 0 : i32
    %62 = tpu.memref_slice %arg6[%46, %c0_i32_28] : memref<8x32xf32, #tpu.memory_space<vmem>> -> memref<1x32xf32, #tpu.memory_space<vmem>>
    %63 = tpu.memref_squeeze %62 : memref<1x32xf32, #tpu.memory_space<vmem>> -> memref<32xf32, #tpu.memory_space<vmem>>
    %64 = tpu.memref_slice %arg7[%59] : memref<8x!tpu.dma_semaphore, #tpu.memory_space<semaphore_mem>> -> memref<1x!tpu.dma_semaphore, #tpu.memory_space<semaphore_mem>>
    %65 = tpu.memref_squeeze %64 : memref<1x!tpu.dma_semaphore, #tpu.memory_space<semaphore_mem>> -> memref<!tpu.dma_semaphore, #tpu.memory_space<semaphore_mem>>
    tpu.enqueue_dma source(%61 : memref<32xf32, #tpu.memory_space<any>>) target(%63 : memref<32xf32, #tpu.memory_space<vmem>>) target_semaphore(%65 : memref<!tpu.dma_semaphore, #tpu.memory_space<semaphore_mem>>)
    %c3_i32 = arith.constant 3 : i32
    %66 = arith.addi %5, %c3_i32 : i32
    %67 = arith.addi %2, %66 : i32
    %68 = arith.index_cast %67 : i32 to index
    %69 = memref.load %arg2[%68] : memref<16xi32, #tpu.memory_space<smem>>
    %c8_i32_29 = arith.constant 8 : i32
    %c0_i32_30 = arith.constant 0 : i32
    %70 = arith.cmpi eq, %c8_i32_29, %c0_i32_30 : i32
    %c1_i32_31 = arith.constant 1 : i32
    %71 = arith.select %70, %c1_i32_31, %c8_i32_29 : i32
    %72 = arith.remsi %66, %71 : i32
    %c0_i32_32 = arith.constant 0 : i32
    %73 = arith.cmpi ne, %72, %c0_i32_32 : i32
    %c0_i32_33 = arith.constant 0 : i32
    %74 = arith.cmpi slt, %72, %c0_i32_33 : i32
    %c0_i32_34 = arith.constant 0 : i32
    %75 = arith.cmpi slt, %71, %c0_i32_34 : i32
    %76 = arith.xori %74, %75 : i1
    %77 = arith.andi %76, %73 : i1
    %78 = arith.addi %72, %71 : i32
    %79 = arith.select %77, %78, %72 : i32
    %c0_i32_35 = arith.constant 0 : i32
    %80 = tpu.memref_slice %arg3[%69, %c0_i32_35] : memref<64x32xf32, #tpu.memory_space<any>> -> memref<1x32xf32, #tpu.memory_space<any>>
    %81 = tpu.memref_squeeze %80 : memref<1x32xf32, #tpu.memory_space<any>> -> memref<32xf32, #tpu.memory_space<any>>
    %c0_i32_36 = arith.constant 0 : i32
    %82 = tpu.memref_slice %arg6[%66, %c0_i32_36] : memref<8x32xf32, #tpu.memory_space<vmem>> -> memref<1x32xf32, #tpu.memory_space<vmem>>
    %83 = tpu.memref_squeeze %82 : memref<1x32xf32, #tpu.memory_space<vmem>> -> memref<32xf32, #tpu.memory_space<vmem>>
    %84 = tpu.memref_slice %arg7[%79] : memref<8x!tpu.dma_semaphore, #tpu.memory_space<semaphore_mem>> -> memref<1x!tpu.dma_semaphore, #tpu.memory_space<semaphore_mem>>
    %85 = tpu.memref_squeeze %84 : memref<1x!tpu.dma_semaphore, #tpu.memory_space<semaphore_mem>> -> memref<!tpu.dma_semaphore, #tpu.memory_space<semaphore_mem>>
    tpu.enqueue_dma source(%81 : memref<32xf32, #tpu.memory_space<any>>) target(%83 : memref<32xf32, #tpu.memory_space<vmem>>) target_semaphore(%85 : memref<!tpu.dma_semaphore, #tpu.memory_space<semaphore_mem>>)
    %c4_i32 = arith.constant 4 : i32
    %86 = arith.addi %5, %c4_i32 : i32
    %87 = arith.addi %2, %86 : i32
    %88 = arith.index_cast %87 : i32 to index
    %89 = memref.load %arg2[%88] : memref<16xi32, #tpu.memory_space<smem>>
    %c8_i32_37 = arith.constant 8 : i32
    %c0_i32_38 = arith.constant 0 : i32
    %90 = arith.cmpi eq, %c8_i32_37, %c0_i32_38 : i32
    %c1_i32_39 = arith.constant 1 : i32
    %91 = arith.select %90, %c1_i32_39, %c8_i32_37 : i32
    %92 = arith.remsi %86, %91 : i32
    %c0_i32_40 = arith.constant 0 : i32
    %93 = arith.cmpi ne, %92, %c0_i32_40 : i32
    %c0_i32_41 = arith.constant 0 : i32
    %94 = arith.cmpi slt, %92, %c0_i32_41 : i32
    %c0_i32_42 = arith.constant 0 : i32
    %95 = arith.cmpi slt, %91, %c0_i32_42 : i32
    %96 = arith.xori %94, %95 : i1
    %97 = arith.andi %96, %93 : i1
    %98 = arith.addi %92, %91 : i32
    %99 = arith.select %97, %98, %92 : i32
    %c0_i32_43 = arith.constant 0 : i32
    %100 = tpu.memref_slice %arg3[%89, %c0_i32_43] : memref<64x32xf32, #tpu.memory_space<any>> -> memref<1x32xf32, #tpu.memory_space<any>>
    %101 = tpu.memref_squeeze %100 : memref<1x32xf32, #tpu.memory_space<any>> -> memref<32xf32, #tpu.memory_space<any>>
    %c0_i32_44 = arith.constant 0 : i32
    %102 = tpu.memref_slice %arg6[%86, %c0_i32_44] : memref<8x32xf32, #tpu.memory_space<vmem>> -> memref<1x32xf32, #tpu.memory_space<vmem>>
    %103 = tpu.memref_squeeze %102 : memref<1x32xf32, #tpu.memory_space<vmem>> -> memref<32xf32, #tpu.memory_space<vmem>>
    %104 = tpu.memref_slice %arg7[%99] : memref<8x!tpu.dma_semaphore, #tpu.memory_space<semaphore_mem>> -> memref<1x!tpu.dma_semaphore, #tpu.memory_space<semaphore_mem>>
    %105 = tpu.memref_squeeze %104 : memref<1x!tpu.dma_semaphore, #tpu.memory_space<semaphore_mem>> -> memref<!tpu.dma_semaphore, #tpu.memory_space<semaphore_mem>>
    tpu.enqueue_dma source(%101 : memref<32xf32, #tpu.memory_space<any>>) target(%103 : memref<32xf32, #tpu.memory_space<vmem>>) target_semaphore(%105 : memref<!tpu.dma_semaphore, #tpu.memory_space<semaphore_mem>>)
    %c5_i32 = arith.constant 5 : i32
    %106 = arith.addi %5, %c5_i32 : i32
    %107 = arith.addi %2, %106 : i32
    %108 = arith.index_cast %107 : i32 to index
    %109 = memref.load %arg2[%108] : memref<16xi32, #tpu.memory_space<smem>>
    %c8_i32_45 = arith.constant 8 : i32
    %c0_i32_46 = arith.constant 0 : i32
    %110 = arith.cmpi eq, %c8_i32_45, %c0_i32_46 : i32
    %c1_i32_47 = arith.constant 1 : i32
    %111 = arith.select %110, %c1_i32_47, %c8_i32_45 : i32
    %112 = arith.remsi %106, %111 : i32
    %c0_i32_48 = arith.constant 0 : i32
    %113 = arith.cmpi ne, %112, %c0_i32_48 : i32
    %c0_i32_49 = arith.constant 0 : i32
    %114 = arith.cmpi slt, %112, %c0_i32_49 : i32
    %c0_i32_50 = arith.constant 0 : i32
    %115 = arith.cmpi slt, %111, %c0_i32_50 : i32
    %116 = arith.xori %114, %115 : i1
    %117 = arith.andi %116, %113 : i1
    %118 = arith.addi %112, %111 : i32
    %119 = arith.select %117, %118, %112 : i32
    %c0_i32_51 = arith.constant 0 : i32
    %120 = tpu.memref_slice %arg3[%109, %c0_i32_51] : memref<64x32xf32, #tpu.memory_space<any>> -> memref<1x32xf32, #tpu.memory_space<any>>
    %121 = tpu.memref_squeeze %120 : memref<1x32xf32, #tpu.memory_space<any>> -> memref<32xf32, #tpu.memory_space<any>>
    %c0_i32_52 = arith.constant 0 : i32
    %122 = tpu.memref_slice %arg6[%106, %c0_i32_52] : memref<8x32xf32, #tpu.memory_space<vmem>> -> memref<1x32xf32, #tpu.memory_space<vmem>>
    %123 = tpu.memref_squeeze %122 : memref<1x32xf32, #tpu.memory_space<vmem>> -> memref<32xf32, #tpu.memory_space<vmem>>
    %124 = tpu.memref_slice %arg7[%119] : memref<8x!tpu.dma_semaphore, #tpu.memory_space<semaphore_mem>> -> memref<1x!tpu.dma_semaphore, #tpu.memory_space<semaphore_mem>>
    %125 = tpu.memref_squeeze %124 : memref<1x!tpu.dma_semaphore, #tpu.memory_space<semaphore_mem>> -> memref<!tpu.dma_semaphore, #tpu.memory_space<semaphore_mem>>
    tpu.enqueue_dma source(%121 : memref<32xf32, #tpu.memory_space<any>>) target(%123 : memref<32xf32, #tpu.memory_space<vmem>>) target_semaphore(%125 : memref<!tpu.dma_semaphore, #tpu.memory_space<semaphore_mem>>)
    %c6_i32 = arith.constant 6 : i32
    %126 = arith.addi %5, %c6_i32 : i32
    %127 = arith.addi %2, %126 : i32
    %128 = arith.index_cast %127 : i32 to index
    %129 = memref.load %arg2[%128] : memref<16xi32, #tpu.memory_space<smem>>
    %c8_i32_53 = arith.constant 8 : i32
    %c0_i32_54 = arith.constant 0 : i32
    %130 = arith.cmpi eq, %c8_i32_53, %c0_i32_54 : i32
    %c1_i32_55 = arith.constant 1 : i32
    %131 = arith.select %130, %c1_i32_55, %c8_i32_53 : i32
    %132 = arith.remsi %126, %131 : i32
    %c0_i32_56 = arith.constant 0 : i32
    %133 = arith.cmpi ne, %132, %c0_i32_56 : i32
    %c0_i32_57 = arith.constant 0 : i32
    %134 = arith.cmpi slt, %132, %c0_i32_57 : i32
    %c0_i32_58 = arith.constant 0 : i32
    %135 = arith.cmpi slt, %131, %c0_i32_58 : i32
    %136 = arith.xori %134, %135 : i1
    %137 = arith.andi %136, %133 : i1
    %138 = arith.addi %132, %131 : i32
    %139 = arith.select %137, %138, %132 : i32
    %c0_i32_59 = arith.constant 0 : i32
    %140 = tpu.memref_slice %arg3[%129, %c0_i32_59] : memref<64x32xf32, #tpu.memory_space<any>> -> memref<1x32xf32, #tpu.memory_space<any>>
    %141 = tpu.memref_squeeze %140 : memref<1x32xf32, #tpu.memory_space<any>> -> memref<32xf32, #tpu.memory_space<any>>
    %c0_i32_60 = arith.constant 0 : i32
    %142 = tpu.memref_slice %arg6[%126, %c0_i32_60] : memref<8x32xf32, #tpu.memory_space<vmem>> -> memref<1x32xf32, #tpu.memory_space<vmem>>
    %143 = tpu.memref_squeeze %142 : memref<1x32xf32, #tpu.memory_space<vmem>> -> memref<32xf32, #tpu.memory_space<vmem>>
    %144 = tpu.memref_slice %arg7[%139] : memref<8x!tpu.dma_semaphore, #tpu.memory_space<semaphore_mem>> -> memref<1x!tpu.dma_semaphore, #tpu.memory_space<semaphore_mem>>
    %145 = tpu.memref_squeeze %144 : memref<1x!tpu.dma_semaphore, #tpu.memory_space<semaphore_mem>> -> memref<!tpu.dma_semaphore, #tpu.memory_space<semaphore_mem>>
    tpu.enqueue_dma source(%141 : memref<32xf32, #tpu.memory_space<any>>) target(%143 : memref<32xf32, #tpu.memory_space<vmem>>) target_semaphore(%145 : memref<!tpu.dma_semaphore, #tpu.memory_space<semaphore_mem>>)
    %c7_i32 = arith.constant 7 : i32
    %146 = arith.addi %5, %c7_i32 : i32
    %147 = arith.addi %2, %146 : i32
    %148 = arith.index_cast %147 : i32 to index
    %149 = memref.load %arg2[%148] : memref<16xi32, #tpu.memory_space<smem>>
    %c8_i32_61 = arith.constant 8 : i32
    %c0_i32_62 = arith.constant 0 : i32
    %150 = arith.cmpi eq, %c8_i32_61, %c0_i32_62 : i32
    %c1_i32_63 = arith.constant 1 : i32
    %151 = arith.select %150, %c1_i32_63, %c8_i32_61 : i32
    %152 = arith.remsi %146, %151 : i32
    %c0_i32_64 = arith.constant 0 : i32
    %153 = arith.cmpi ne, %152, %c0_i32_64 : i32
    %c0_i32_65 = arith.constant 0 : i32
    %154 = arith.cmpi slt, %152, %c0_i32_65 : i32
    %c0_i32_66 = arith.constant 0 : i32
    %155 = arith.cmpi slt, %151, %c0_i32_66 : i32
    %156 = arith.xori %154, %155 : i1
    %157 = arith.andi %156, %153 : i1
    %158 = arith.addi %152, %151 : i32
    %159 = arith.select %157, %158, %152 : i32
    %c0_i32_67 = arith.constant 0 : i32
    %160 = tpu.memref_slice %arg3[%149, %c0_i32_67] : memref<64x32xf32, #tpu.memory_space<any>> -> memref<1x32xf32, #tpu.memory_space<any>>
    %161 = tpu.memref_squeeze %160 : memref<1x32xf32, #tpu.memory_space<any>> -> memref<32xf32, #tpu.memory_space<any>>
    %c0_i32_68 = arith.constant 0 : i32
    %162 = tpu.memref_slice %arg6[%146, %c0_i32_68] : memref<8x32xf32, #tpu.memory_space<vmem>> -> memref<1x32xf32, #tpu.memory_space<vmem>>
    %163 = tpu.memref_squeeze %162 : memref<1x32xf32, #tpu.memory_space<vmem>> -> memref<32xf32, #tpu.memory_space<vmem>>
    %164 = tpu.memref_slice %arg7[%159] : memref<8x!tpu.dma_semaphore, #tpu.memory_space<semaphore_mem>> -> memref<1x!tpu.dma_semaphore, #tpu.memory_space<semaphore_mem>>
    %165 = tpu.memref_squeeze %164 : memref<1x!tpu.dma_semaphore, #tpu.memory_space<semaphore_mem>> -> memref<!tpu.dma_semaphore, #tpu.memory_space<semaphore_mem>>
    tpu.enqueue_dma source(%161 : memref<32xf32, #tpu.memory_space<any>>) target(%163 : memref<32xf32, #tpu.memory_space<vmem>>) target_semaphore(%165 : memref<!tpu.dma_semaphore, #tpu.memory_space<semaphore_mem>>)
    %c1_i32_69 = arith.constant 1 : i32
    %c0_i32_70 = arith.constant 0 : i32
    %c1_i32_71 = arith.constant 1 : i32
    %166 = arith.muli %c0_i32_70, %c1_i32_71 : i32
    %c0_i32_72 = arith.constant 0 : i32
    %167 = arith.addi %c0_i32_72, %166 : i32
    %c8_i32_73 = arith.constant 8 : i32
    %168 = arith.muli %167, %c8_i32_73 : i32
    %c0_i32_74 = arith.constant 0 : i32
    %169 = arith.addi %168, %c0_i32_74 : i32
    %c8_i32_75 = arith.constant 8 : i32
    %c0_i32_76 = arith.constant 0 : i32
    %170 = arith.cmpi eq, %c8_i32_75, %c0_i32_76 : i32
    %c1_i32_77 = arith.constant 1 : i32
    %171 = arith.select %170, %c1_i32_77, %c8_i32_75 : i32
    %172 = arith.remsi %169, %171 : i32
    %c0_i32_78 = arith.constant 0 : i32
    %173 = arith.cmpi ne, %172, %c0_i32_78 : i32
    %c0_i32_79 = arith.constant 0 : i32
    %174 = arith.cmpi slt, %172, %c0_i32_79 : i32
    %c0_i32_80 = arith.constant 0 : i32
    %175 = arith.cmpi slt, %171, %c0_i32_80 : i32
    %176 = arith.xori %174, %175 : i1
    %177 = arith.andi %176, %173 : i1
    %178 = arith.addi %172, %171 : i32
    %179 = arith.select %177, %178, %172 : i32
    %c0_i32_81 = arith.constant 0 : i32
    %c0_i32_82 = arith.constant 0 : i32
    %180 = tpu.memref_slice %arg3[%c0_i32_81, %c0_i32_82] : memref<64x32xf32, #tpu.memory_space<any>> -> memref<1x32xf32, #tpu.memory_space<any>>
    %181 = tpu.memref_squeeze %180 : memref<1x32xf32, #tpu.memory_space<any>> -> memref<32xf32, #tpu.memory_space<any>>
    %c0_i32_83 = arith.constant 0 : i32
    %182 = tpu.memref_slice %arg6[%169, %c0_i32_83] : memref<8x32xf32, #tpu.memory_space<vmem>> -> memref<1x32xf32, #tpu.memory_space<vmem>>
    %183 = tpu.memref_squeeze %182 : memref<1x32xf32, #tpu.memory_space<vmem>> -> memref<32xf32, #tpu.memory_space<vmem>>
    %184 = tpu.memref_slice %arg7[%179] : memref<8x!tpu.dma_semaphore, #tpu.memory_space<semaphore_mem>> -> memref<1x!tpu.dma_semaphore, #tpu.memory_space<semaphore_mem>>
    %185 = tpu.memref_squeeze %184 : memref<1x!tpu.dma_semaphore, #tpu.memory_space<semaphore_mem>> -> memref<!tpu.dma_semaphore, #tpu.memory_space<semaphore_mem>>
    tpu.wait_dma2 semaphore(%185 : memref<!tpu.dma_semaphore, #tpu.memory_space<semaphore_mem>>) src(%181 : memref<32xf32, #tpu.memory_space<any>>) dst(%183 : memref<32xf32, #tpu.memory_space<vmem>>)
    %c1_i32_84 = arith.constant 1 : i32
    %186 = arith.addi %168, %c1_i32_84 : i32
    %c8_i32_85 = arith.constant 8 : i32
    %c0_i32_86 = arith.constant 0 : i32
    %187 = arith.cmpi eq, %c8_i32_85, %c0_i32_86 : i32
    %c1_i32_87 = arith.constant 1 : i32
    %188 = arith.select %187, %c1_i32_87, %c8_i32_85 : i32
    %189 = arith.remsi %186, %188 : i32
    %c0_i32_88 = arith.constant 0 : i32
    %190 = arith.cmpi ne, %189, %c0_i32_88 : i32
    %c0_i32_89 = arith.constant 0 : i32
    %191 = arith.cmpi slt, %189, %c0_i32_89 : i32
    %c0_i32_90 = arith.constant 0 : i32
    %192 = arith.cmpi slt, %188, %c0_i32_90 : i32
    %193 = arith.xori %191, %192 : i1
    %194 = arith.andi %193, %190 : i1
    %195 = arith.addi %189, %188 : i32
    %196 = arith.select %194, %195, %189 : i32
    %c0_i32_91 = arith.constant 0 : i32
    %c0_i32_92 = arith.constant 0 : i32
    %197 = tpu.memref_slice %arg3[%c0_i32_91, %c0_i32_92] : memref<64x32xf32, #tpu.memory_space<any>> -> memref<1x32xf32, #tpu.memory_space<any>>
    %198 = tpu.memref_squeeze %197 : memref<1x32xf32, #tpu.memory_space<any>> -> memref<32xf32, #tpu.memory_space<any>>
    %c0_i32_93 = arith.constant 0 : i32
    %199 = tpu.memref_slice %arg6[%186, %c0_i32_93] : memref<8x32xf32, #tpu.memory_space<vmem>> -> memref<1x32xf32, #tpu.memory_space<vmem>>
    %200 = tpu.memref_squeeze %199 : memref<1x32xf32, #tpu.memory_space<vmem>> -> memref<32xf32, #tpu.memory_space<vmem>>
    %201 = tpu.memref_slice %arg7[%196] : memref<8x!tpu.dma_semaphore, #tpu.memory_space<semaphore_mem>> -> memref<1x!tpu.dma_semaphore, #tpu.memory_space<semaphore_mem>>
    %202 = tpu.memref_squeeze %201 : memref<1x!tpu.dma_semaphore, #tpu.memory_space<semaphore_mem>> -> memref<!tpu.dma_semaphore, #tpu.memory_space<semaphore_mem>>
    tpu.wait_dma2 semaphore(%202 : memref<!tpu.dma_semaphore, #tpu.memory_space<semaphore_mem>>) src(%198 : memref<32xf32, #tpu.memory_space<any>>) dst(%200 : memref<32xf32, #tpu.memory_space<vmem>>)
    %c2_i32_94 = arith.constant 2 : i32
    %203 = arith.addi %168, %c2_i32_94 : i32
    %c8_i32_95 = arith.constant 8 : i32
    %c0_i32_96 = arith.constant 0 : i32
    %204 = arith.cmpi eq, %c8_i32_95, %c0_i32_96 : i32
    %c1_i32_97 = arith.constant 1 : i32
    %205 = arith.select %204, %c1_i32_97, %c8_i32_95 : i32
    %206 = arith.remsi %203, %205 : i32
    %c0_i32_98 = arith.constant 0 : i32
    %207 = arith.cmpi ne, %206, %c0_i32_98 : i32
    %c0_i32_99 = arith.constant 0 : i32
    %208 = arith.cmpi slt, %206, %c0_i32_99 : i32
    %c0_i32_100 = arith.constant 0 : i32
    %209 = arith.cmpi slt, %205, %c0_i32_100 : i32
    %210 = arith.xori %208, %209 : i1
    %211 = arith.andi %210, %207 : i1
    %212 = arith.addi %206, %205 : i32
    %213 = arith.select %211, %212, %206 : i32
    %c0_i32_101 = arith.constant 0 : i32
    %c0_i32_102 = arith.constant 0 : i32
    %214 = tpu.memref_slice %arg3[%c0_i32_101, %c0_i32_102] : memref<64x32xf32, #tpu.memory_space<any>> -> memref<1x32xf32, #tpu.memory_space<any>>
    %215 = tpu.memref_squeeze %214 : memref<1x32xf32, #tpu.memory_space<any>> -> memref<32xf32, #tpu.memory_space<any>>
    %c0_i32_103 = arith.constant 0 : i32
    %216 = tpu.memref_slice %arg6[%203, %c0_i32_103] : memref<8x32xf32, #tpu.memory_space<vmem>> -> memref<1x32xf32, #tpu.memory_space<vmem>>
    %217 = tpu.memref_squeeze %216 : memref<1x32xf32, #tpu.memory_space<vmem>> -> memref<32xf32, #tpu.memory_space<vmem>>
    %218 = tpu.memref_slice %arg7[%213] : memref<8x!tpu.dma_semaphore, #tpu.memory_space<semaphore_mem>> -> memref<1x!tpu.dma_semaphore, #tpu.memory_space<semaphore_mem>>
    %219 = tpu.memref_squeeze %218 : memref<1x!tpu.dma_semaphore, #tpu.memory_space<semaphore_mem>> -> memref<!tpu.dma_semaphore, #tpu.memory_space<semaphore_mem>>
    tpu.wait_dma2 semaphore(%219 : memref<!tpu.dma_semaphore, #tpu.memory_space<semaphore_mem>>) src(%215 : memref<32xf32, #tpu.memory_space<any>>) dst(%217 : memref<32xf32, #tpu.memory_space<vmem>>)
    %c3_i32_104 = arith.constant 3 : i32
    %220 = arith.addi %168, %c3_i32_104 : i32
    %c8_i32_105 = arith.constant 8 : i32
    %c0_i32_106 = arith.constant 0 : i32
    %221 = arith.cmpi eq, %c8_i32_105, %c0_i32_106 : i32
    %c1_i32_107 = arith.constant 1 : i32
    %222 = arith.select %221, %c1_i32_107, %c8_i32_105 : i32
    %223 = arith.remsi %220, %222 : i32
    %c0_i32_108 = arith.constant 0 : i32
    %224 = arith.cmpi ne, %223, %c0_i32_108 : i32
    %c0_i32_109 = arith.constant 0 : i32
    %225 = arith.cmpi slt, %223, %c0_i32_109 : i32
    %c0_i32_110 = arith.constant 0 : i32
    %226 = arith.cmpi slt, %222, %c0_i32_110 : i32
    %227 = arith.xori %225, %226 : i1
    %228 = arith.andi %227, %224 : i1
    %229 = arith.addi %223, %222 : i32
    %230 = arith.select %228, %229, %223 : i32
    %c0_i32_111 = arith.constant 0 : i32
    %c0_i32_112 = arith.constant 0 : i32
    %231 = tpu.memref_slice %arg3[%c0_i32_111, %c0_i32_112] : memref<64x32xf32, #tpu.memory_space<any>> -> memref<1x32xf32, #tpu.memory_space<any>>
    %232 = tpu.memref_squeeze %231 : memref<1x32xf32, #tpu.memory_space<any>> -> memref<32xf32, #tpu.memory_space<any>>
    %c0_i32_113 = arith.constant 0 : i32
    %233 = tpu.memref_slice %arg6[%220, %c0_i32_113] : memref<8x32xf32, #tpu.memory_space<vmem>> -> memref<1x32xf32, #tpu.memory_space<vmem>>
    %234 = tpu.memref_squeeze %233 : memref<1x32xf32, #tpu.memory_space<vmem>> -> memref<32xf32, #tpu.memory_space<vmem>>
    %235 = tpu.memref_slice %arg7[%230] : memref<8x!tpu.dma_semaphore, #tpu.memory_space<semaphore_mem>> -> memref<1x!tpu.dma_semaphore, #tpu.memory_space<semaphore_mem>>
    %236 = tpu.memref_squeeze %235 : memref<1x!tpu.dma_semaphore, #tpu.memory_space<semaphore_mem>> -> memref<!tpu.dma_semaphore, #tpu.memory_space<semaphore_mem>>
    tpu.wait_dma2 semaphore(%236 : memref<!tpu.dma_semaphore, #tpu.memory_space<semaphore_mem>>) src(%232 : memref<32xf32, #tpu.memory_space<any>>) dst(%234 : memref<32xf32, #tpu.memory_space<vmem>>)
    %c4_i32_114 = arith.constant 4 : i32
    %237 = arith.addi %168, %c4_i32_114 : i32
    %c8_i32_115 = arith.constant 8 : i32
    %c0_i32_116 = arith.constant 0 : i32
    %238 = arith.cmpi eq, %c8_i32_115, %c0_i32_116 : i32
    %c1_i32_117 = arith.constant 1 : i32
    %239 = arith.select %238, %c1_i32_117, %c8_i32_115 : i32
    %240 = arith.remsi %237, %239 : i32
    %c0_i32_118 = arith.constant 0 : i32
    %241 = arith.cmpi ne, %240, %c0_i32_118 : i32
    %c0_i32_119 = arith.constant 0 : i32
    %242 = arith.cmpi slt, %240, %c0_i32_119 : i32
    %c0_i32_120 = arith.constant 0 : i32
    %243 = arith.cmpi slt, %239, %c0_i32_120 : i32
    %244 = arith.xori %242, %243 : i1
    %245 = arith.andi %244, %241 : i1
    %246 = arith.addi %240, %239 : i32
    %247 = arith.select %245, %246, %240 : i32
    %c0_i32_121 = arith.constant 0 : i32
    %c0_i32_122 = arith.constant 0 : i32
    %248 = tpu.memref_slice %arg3[%c0_i32_121, %c0_i32_122] : memref<64x32xf32, #tpu.memory_space<any>> -> memref<1x32xf32, #tpu.memory_space<any>>
    %249 = tpu.memref_squeeze %248 : memref<1x32xf32, #tpu.memory_space<any>> -> memref<32xf32, #tpu.memory_space<any>>
    %c0_i32_123 = arith.constant 0 : i32
    %250 = tpu.memref_slice %arg6[%237, %c0_i32_123] : memref<8x32xf32, #tpu.memory_space<vmem>> -> memref<1x32xf32, #tpu.memory_space<vmem>>
    %251 = tpu.memref_squeeze %250 : memref<1x32xf32, #tpu.memory_space<vmem>> -> memref<32xf32, #tpu.memory_space<vmem>>
    %252 = tpu.memref_slice %arg7[%247] : memref<8x!tpu.dma_semaphore, #tpu.memory_space<semaphore_mem>> -> memref<1x!tpu.dma_semaphore, #tpu.memory_space<semaphore_mem>>
    %253 = tpu.memref_squeeze %252 : memref<1x!tpu.dma_semaphore, #tpu.memory_space<semaphore_mem>> -> memref<!tpu.dma_semaphore, #tpu.memory_space<semaphore_mem>>
    tpu.wait_dma2 semaphore(%253 : memref<!tpu.dma_semaphore, #tpu.memory_space<semaphore_mem>>) src(%249 : memref<32xf32, #tpu.memory_space<any>>) dst(%251 : memref<32xf32, #tpu.memory_space<vmem>>)
    %c5_i32_124 = arith.constant 5 : i32
    %254 = arith.addi %168, %c5_i32_124 : i32
    %c8_i32_125 = arith.constant 8 : i32
    %c0_i32_126 = arith.constant 0 : i32
    %255 = arith.cmpi eq, %c8_i32_125, %c0_i32_126 : i32
    %c1_i32_127 = arith.constant 1 : i32
    %256 = arith.select %255, %c1_i32_127, %c8_i32_125 : i32
    %257 = arith.remsi %254, %256 : i32
    %c0_i32_128 = arith.constant 0 : i32
    %258 = arith.cmpi ne, %257, %c0_i32_128 : i32
    %c0_i32_129 = arith.constant 0 : i32
    %259 = arith.cmpi slt, %257, %c0_i32_129 : i32
    %c0_i32_130 = arith.constant 0 : i32
    %260 = arith.cmpi slt, %256, %c0_i32_130 : i32
    %261 = arith.xori %259, %260 : i1
    %262 = arith.andi %261, %258 : i1
    %263 = arith.addi %257, %256 : i32
    %264 = arith.select %262, %263, %257 : i32
    %c0_i32_131 = arith.constant 0 : i32
    %c0_i32_132 = arith.constant 0 : i32
    %265 = tpu.memref_slice %arg3[%c0_i32_131, %c0_i32_132] : memref<64x32xf32, #tpu.memory_space<any>> -> memref<1x32xf32, #tpu.memory_space<any>>
    %266 = tpu.memref_squeeze %265 : memref<1x32xf32, #tpu.memory_space<any>> -> memref<32xf32, #tpu.memory_space<any>>
    %c0_i32_133 = arith.constant 0 : i32
    %267 = tpu.memref_slice %arg6[%254, %c0_i32_133] : memref<8x32xf32, #tpu.memory_space<vmem>> -> memref<1x32xf32, #tpu.memory_space<vmem>>
    %268 = tpu.memref_squeeze %267 : memref<1x32xf32, #tpu.memory_space<vmem>> -> memref<32xf32, #tpu.memory_space<vmem>>
    %269 = tpu.memref_slice %arg7[%264] : memref<8x!tpu.dma_semaphore, #tpu.memory_space<semaphore_mem>> -> memref<1x!tpu.dma_semaphore, #tpu.memory_space<semaphore_mem>>
    %270 = tpu.memref_squeeze %269 : memref<1x!tpu.dma_semaphore, #tpu.memory_space<semaphore_mem>> -> memref<!tpu.dma_semaphore, #tpu.memory_space<semaphore_mem>>
    tpu.wait_dma2 semaphore(%270 : memref<!tpu.dma_semaphore, #tpu.memory_space<semaphore_mem>>) src(%266 : memref<32xf32, #tpu.memory_space<any>>) dst(%268 : memref<32xf32, #tpu.memory_space<vmem>>)
    %c6_i32_134 = arith.constant 6 : i32
    %271 = arith.addi %168, %c6_i32_134 : i32
    %c8_i32_135 = arith.constant 8 : i32
    %c0_i32_136 = arith.constant 0 : i32
    %272 = arith.cmpi eq, %c8_i32_135, %c0_i32_136 : i32
    %c1_i32_137 = arith.constant 1 : i32
    %273 = arith.select %272, %c1_i32_137, %c8_i32_135 : i32
    %274 = arith.remsi %271, %273 : i32
    %c0_i32_138 = arith.constant 0 : i32
    %275 = arith.cmpi ne, %274, %c0_i32_138 : i32
    %c0_i32_139 = arith.constant 0 : i32
    %276 = arith.cmpi slt, %274, %c0_i32_139 : i32
    %c0_i32_140 = arith.constant 0 : i32
    %277 = arith.cmpi slt, %273, %c0_i32_140 : i32
    %278 = arith.xori %276, %277 : i1
    %279 = arith.andi %278, %275 : i1
    %280 = arith.addi %274, %273 : i32
    %281 = arith.select %279, %280, %274 : i32
    %c0_i32_141 = arith.constant 0 : i32
    %c0_i32_142 = arith.constant 0 : i32
    %282 = tpu.memref_slice %arg3[%c0_i32_141, %c0_i32_142] : memref<64x32xf32, #tpu.memory_space<any>> -> memref<1x32xf32, #tpu.memory_space<any>>
    %283 = tpu.memref_squeeze %282 : memref<1x32xf32, #tpu.memory_space<any>> -> memref<32xf32, #tpu.memory_space<any>>
    %c0_i32_143 = arith.constant 0 : i32
    %284 = tpu.memref_slice %arg6[%271, %c0_i32_143] : memref<8x32xf32, #tpu.memory_space<vmem>> -> memref<1x32xf32, #tpu.memory_space<vmem>>
    %285 = tpu.memref_squeeze %284 : memref<1x32xf32, #tpu.memory_space<vmem>> -> memref<32xf32, #tpu.memory_space<vmem>>
    %286 = tpu.memref_slice %arg7[%281] : memref<8x!tpu.dma_semaphore, #tpu.memory_space<semaphore_mem>> -> memref<1x!tpu.dma_semaphore, #tpu.memory_space<semaphore_mem>>
    %287 = tpu.memref_squeeze %286 : memref<1x!tpu.dma_semaphore, #tpu.memory_space<semaphore_mem>> -> memref<!tpu.dma_semaphore, #tpu.memory_space<semaphore_mem>>
    tpu.wait_dma2 semaphore(%287 : memref<!tpu.dma_semaphore, #tpu.memory_space<semaphore_mem>>) src(%283 : memref<32xf32, #tpu.memory_space<any>>) dst(%285 : memref<32xf32, #tpu.memory_space<vmem>>)
    %c7_i32_144 = arith.constant 7 : i32
    %288 = arith.addi %168, %c7_i32_144 : i32
    %c8_i32_145 = arith.constant 8 : i32
    %c0_i32_146 = arith.constant 0 : i32
    %289 = arith.cmpi eq, %c8_i32_145, %c0_i32_146 : i32
    %c1_i32_147 = arith.constant 1 : i32
    %290 = arith.select %289, %c1_i32_147, %c8_i32_145 : i32
    %291 = arith.remsi %288, %290 : i32
    %c0_i32_148 = arith.constant 0 : i32
    %292 = arith.cmpi ne, %291, %c0_i32_148 : i32
    %c0_i32_149 = arith.constant 0 : i32
    %293 = arith.cmpi slt, %291, %c0_i32_149 : i32
    %c0_i32_150 = arith.constant 0 : i32
    %294 = arith.cmpi slt, %290, %c0_i32_150 : i32
    %295 = arith.xori %293, %294 : i1
    %296 = arith.andi %295, %292 : i1
    %297 = arith.addi %291, %290 : i32
    %298 = arith.select %296, %297, %291 : i32
    %c0_i32_151 = arith.constant 0 : i32
    %c0_i32_152 = arith.constant 0 : i32
    %299 = tpu.memref_slice %arg3[%c0_i32_151, %c0_i32_152] : memref<64x32xf32, #tpu.memory_space<any>> -> memref<1x32xf32, #tpu.memory_space<any>>
    %300 = tpu.memref_squeeze %299 : memref<1x32xf32, #tpu.memory_space<any>> -> memref<32xf32, #tpu.memory_space<any>>
    %c0_i32_153 = arith.constant 0 : i32
    %301 = tpu.memref_slice %arg6[%288, %c0_i32_153] : memref<8x32xf32, #tpu.memory_space<vmem>> -> memref<1x32xf32, #tpu.memory_space<vmem>>
    %302 = tpu.memref_squeeze %301 : memref<1x32xf32, #tpu.memory_space<vmem>> -> memref<32xf32, #tpu.memory_space<vmem>>
    %303 = tpu.memref_slice %arg7[%298] : memref<8x!tpu.dma_semaphore, #tpu.memory_space<semaphore_mem>> -> memref<1x!tpu.dma_semaphore, #tpu.memory_space<semaphore_mem>>
    %304 = tpu.memref_squeeze %303 : memref<1x!tpu.dma_semaphore, #tpu.memory_space<semaphore_mem>> -> memref<!tpu.dma_semaphore, #tpu.memory_space<semaphore_mem>>
    tpu.wait_dma2 semaphore(%304 : memref<!tpu.dma_semaphore, #tpu.memory_space<semaphore_mem>>) src(%300 : memref<32xf32, #tpu.memory_space<any>>) dst(%302 : memref<32xf32, #tpu.memory_space<vmem>>)
    %c1_i32_154 = arith.constant 1 : i32
    %c0 = arith.constant 0 : index
    %c0_155 = arith.constant 0 : index
    %305 = vector.load %arg6[%c0, %c0_155] : memref<8x32xf32, #tpu.memory_space<vmem>>, vector<8x32xf32>
    %c0_156 = arith.constant 0 : index
    %c0_157 = arith.constant 0 : index
    %306 = vector.load %arg4[%c0_156, %c0_157] : memref<8x32xf32, #tpu.memory_space<vmem>>, vector<8x32xf32>
    %307 = arith.addf %305, %306 : vector<8x32xf32>
    %c0_158 = arith.constant 0 : index
    %c0_159 = arith.constant 0 : index
    %c0_160 = arith.constant 0 : index
    %308 = vector.load %arg5[%c0_158, %c0_159, %c0_160] : memref<1x8x32xf32, #tpu.memory_space<vmem>>, vector<1x8x32xf32>
    %309 = vector.shape_cast %308 : vector<1x8x32xf32> to vector<8x32xf32>
    %310 = vector.shape_cast %307 : vector<8x32xf32> to vector<1x8x32xf32>
    tpu.vector_store %arg5[%c0_158, %c0_159, %c0_160], %310 {strides = array<i32>} : memref<1x8x32xf32, #tpu.memory_space<vmem>>, vector<1x8x32xf32>,
    return
  }
  func.func @transform_1(%arg0: i32, %arg1: i32, %arg2: memref<16xi32, #tpu.memory_space<smem>>) -> (i32, i32) {
    %c0_i32 = arith.constant 0 : i32
    %c0_i32_0 = arith.constant 0 : i32
    return %arg0, %c0_i32 : i32, i32
  }
  func.func @transform_2(%arg0: i32, %arg1: i32, %arg2: memref<16xi32, #tpu.memory_space<smem>>) -> (i32, i32, i32) {
    %c0_i32 = arith.constant 0 : i32
    %c0_i32_0 = arith.constant 0 : i32
    return %arg1, %arg0, %c0_i32 : i32, i32, i32
  }
}

</mosaic_0001>

<bundles_post_ra>
// kernel: tpu_custom_call.1
= control target key start
LH: loop header
LB: loop body
LE: loop exit
PB: predicated region body
PF: predicated region fallthrough
CT: control target
= control target key end

     0   :  { %s1149_s0 = inlined_call_operand.vmem [shape: s32[16], index: 0, kind: input, shape index: {}]   ;;  %s1150_s1 = inlined_call_operand.vmem [shape: f32[64,32], index: 1, kind: input, shape index: {}]   ;;  %s1151_s2 = inlined_call_operand.vmem [shape: f32[16,32], index: 2, kind: input, shape index: {}]   ;;  %s1152_s3 = inlined_call_operand.hbm [shape: f32[2,8,32], index: 3, kind: output, shape index: {}]  }
   0x1   :  { %s8_s14 = sshll.u32 %s1149_s0, 4  ;;  %s9_s14 = int_to_ptr.vmem [resolvable:$true] %s8_s14 }
   0x2   :  { %s858_s15 = scalar_lea.vmem %s9_s14, 16  ;;  %p863_p1 = scmp.lt.s32.totalorder %s9_s14, %s9_s14 }
   0x3   :  { %p859_p0 = scmp.ne.s32.totalorder %s9_s14, %s858_s15  ;;  %p864_p2 = scmp.lt.s32.totalorder %s858_s15, %s858_s15 }
   0x5   :  { %p865_p3 = por %p864_p2, %p863_p1 }
   0x7   :  { %p866_p4 = pnand %p865_p3, %p859_p0 }
   0x9   :  { %869 = shalt.err (!%p866_p4)  }
   0xa   :  { %s968_s16 = smov [#allocation5]  }
   0xb   :  { %11 = dma.vmem_to_smem %s9_s14, 16, %s968_s16, [#allocation4] }
   0xc   :  { %922 = dma.done.wait [#allocation4], 16 }
   0xd   :  { %923 = vsyncadd [#allocation4], 4294967280 }
   0xe   :  { %13 = sfence }
   0xf   :  { %14 = vsyncpa [#allocation7], 0 }
  0x10   :  { %16 = vsyncpa [#allocation7 + $0x1], 0  ;;  %s993_s17 = smov 0   ;;  %s995_s18 = smov 0  }
  0x11   :  { %s997_s0 = smov 0   ;;  %s999_s19 = smov 0  }
  0x12   :  { %s1001_s20 = smov 0   ;;  %s1003_s21 = smov 0  }
  0x13 LB: > { %s783_s22 = sadd.s32 4294967295, %s966_s21   ;;  %s784_s23 = sadd.s32 4294967294, %s966_s21   ;;  %s966_s21 = sphi %s1003_s21, %s22_s21   ;;  %s962_s20 = sphi %s1001_s20, %s1159_s20   ;;  %s958_s19 = sphi %s999_s19, %s1158_s19   ;;  %s954_s0 = sphi %s997_s0, %s1157_s0   ;;  %s950_s18 = sphi %s995_s18, %s1156_s18   ;;  %s946_s17 = sphi %s993_s17, %s1155_s17  }
  0x14   : > { %s31_s24 = sadd.s32 1, %s962_s20  ;;  %s69_s25 = sadd.s32 1, %s954_s0 }
  0x15   : > { %p32_p5 = scmp.ge.s32.totalorder %s31_s24, 2  ;;  %p79_p6 = scmp.ne.s32.totalorder %s954_s0, %s950_s18 }
  0x16   : > { %p80_p7 = scmp.eq.s32.totalorder %s783_s22, 1  ;;  %p85_p8 = scmp.ne.s32.totalorder %s950_s18, %s946_s17 }
  0x17   : > { %s1161_s24 = smov (%p32_p5, %s31_s24), 0  ;;  %p86_p10 = scmp.eq.s32.totalorder %s784_s23, 1 }
  0x18   : > { %p1033_p9 = por %p80_p7, %p79_p6  ;;  %s64_s27 = ssub.s32 %s962_s20, %s1161_s24 }
  0x19   : > { %p787_p11 = scmp.ge.s32.totalorder %s966_s21, 1  ;;  %p67_p12 = scmp.eq.s32.totalorder %s64_s27, 0 }
  0x1a   : > { %p1040_p13 = por %p86_p10, %p85_p8  ;;  %p111_p0 = scmp.lt.s32.totalorder %s966_s21, 3 }
  0x1b   : > { %s1046_s29 = scalar_select %p67_p12, %s954_s0, %s69_s25  }
  0x1c   : > { %p112_p1 = pnand %p787_p11, %p111_p0 }
  0x1d   : > { %s127_s30 = sand.u32 (!%p112_p1), 1, %s950_s18   ;;  %s1050_s4 = sshll.u32 (!%p112_p1), %s958_s19, 3 }
  0x1e   : > { %115 = sbr.rel (%p112_p1) target bundleno = 150 (0x96), region = 24  ;;  %s1054_s5 = sshll.u32 (!%p112_p1), %s127_s30, 3 }
  0x1f   : > { %s137_s6 = sld [smem:[#allocation5 + %s1050_s4]] (!%p112_p1)  ;;  %s129_s10 = scalar_lea.vmem (!%p112_p1), [#allocation6], %s1054_s5 }
  0x25   : > { %s138_s9 = scalar_lea.vmem %s1150_s1, %s137_s6 }
  0x26   : > { %v156_v0 = vld [vmem:[%s138_s9] sm:$0x1] }
  0x27   : > { %157 = vst [vmem:[#allocation2] sm:$0x1] %v156_v0 }
  0x28   : > { %182 = vsyncadd [#allocation3], 16  ;;  %s183_s11 = sadd.s32 1, %s1050_s4 }
  0x29   : > { %s184_s12 = sld [smem:[#allocation5 + %s183_s11]] }
  0x2f   : > { %s185_s15 = scalar_lea.vmem %s1150_s1, %s184_s12 }
  0x30   : > { %v205_v1 = vld [vmem:[%s185_s15] sm:$0x1] }
  0x31   : > { %206 = vst [vmem:[#allocation2 + $0x1] sm:$0x1] %v205_v1 }
  0x32   : > { %231 = vsyncadd [#allocation3 + $0x1], 16  ;;  %s232_s16 = sadd.s32 2, %s1050_s4 }
  0x33   : > { %s233_s22 = sld [smem:[#allocation5 + %s232_s16]] }
  0x39   : > { %s234_s27 = scalar_lea.vmem %s1150_s1, %s233_s22 }
  0x3a   : > { %v254_v2 = vld [vmem:[%s234_s27] sm:$0x1] }
  0x3b   : > { %255 = vst [vmem:[#allocation2 + $0x2] sm:$0x1] %v254_v2 }
  0x3c   : > { %280 = vsyncadd [#allocation3 + $0x2], 16  ;;  %s281_s6 = sadd.s32 3, %s1050_s4 }
  0x3d   : > { %s282_s7 = sld [smem:[#allocation5 + %s281_s6]] }
  0x43   : > { %s283_s11 = scalar_lea.vmem %s1150_s1, %s282_s7 }
  0x44   : > { %v303_v3 = vld [vmem:[%s283_s11] sm:$0x1] }
  0x45   : > { %304 = vst [vmem:[#allocation2 + $0x3] sm:$0x1] %v303_v3 }
  0x46   : > { %329 = vsyncadd [#allocation3 + $0x3], 16  ;;  %s330_s12 = sadd.s32 4, %s1050_s4 }
  0x47   : > { %s331_s13 = sld [smem:[#allocation5 + %s330_s12]] }
  0x4d   : > { %s332_s16 = scalar_lea.vmem %s1150_s1, %s331_s13 }
  0x4e   : > { %v352_v4 = vld [vmem:[%s332_s16] sm:$0x1] }
  0x4f   : > { %353 = vst [vmem:[#allocation2 + $0x4] sm:$0x1] %v352_v4 }
  0x50   : > { %378 = vsyncadd [#allocation3 + $0x4], 16  ;;  %s379_s22 = sadd.s32 5, %s1050_s4 }
  0x51   : > { %s380_s23 = sld [smem:[#allocation5 + %s379_s22]] }
  0x57   : > { %s381_s6 = scalar_lea.vmem %s1150_s1, %s380_s23 }
  0x58   : > { %v401_v5 = vld [vmem:[%s381_s6] sm:$0x1] }
  0x59   : > { %402 = vst [vmem:[#allocation2 + $0x5] sm:$0x1] %v401_v5 }
  0x5a   : > { %427 = vsyncadd [#allocation3 + $0x5], 16  ;;  %s428_s7 = sadd.s32 6, %s1050_s4 }
  0x5b   : > { %s429_s8 = sld [smem:[#allocation5 + %s428_s7]] }
  0x61   : > { %s430_s12 = scalar_lea.vmem %s1150_s1, %s429_s8 }
  0x62   : > { %v450_v6 = vld [vmem:[%s430_s12] sm:$0x1] }
  0x63   : > { %451 = vst [vmem:[#allocation2 + $0x6] sm:$0x1] %v450_v6 }
  0x64   : > { %476 = vsyncadd [#allocation3 + $0x6], 16  ;;  %s477_s13 = sadd.s32 7, %s1050_s4 }
  0x65   : > { %s478_s14 = sld [smem:[#allocation5 + %s477_s13]] }
  0x6b   : > { %s479_s22 = scalar_lea.vmem %s1150_s1, %s478_s14 }
  0x6c   : > { %v499_v7 = vld [vmem:[%s479_s22] sm:$0x1] }
  0x6d   : > { %500 = vst [vmem:[#allocation2 + $0x7] sm:$0x1] %v499_v7 }
  0x6e   : > { %525 = vsyncadd [#allocation3 + $0x7], 16 }
  0x6f   : > { %924 = dma.done.wait [#allocation3], 16 }
  0x70   : > { %925 = vsyncadd [#allocation3], 4294967280 }
  0x71   : > { %926 = dma.done.wait [#allocation3 + $0x1], 16 }
  0x72   : > { %927 = vsyncadd [#allocation3 + $0x1], 4294967280 }
  0x73   : > { %928 = dma.done.wait [#allocation3 + $0x2], 16 }
  0x74   : > { %929 = vsyncadd [#allocation3 + $0x2], 4294967280 }
  0x75   : > { %930 = dma.done.wait [#allocation3 + $0x3], 16 }
  0x76   : > { %931 = vsyncadd [#allocation3 + $0x3], 4294967280 }
  0x77   : > { %932 = dma.done.wait [#allocation3 + $0x4], 16 }
  0x78   : > { %933 = vsyncadd [#allocation3 + $0x4], 4294967280 }
  0x79   : > { %934 = dma.done.wait [#allocation3 + $0x5], 16 }
  0x7a   : > { %935 = vsyncadd [#allocation3 + $0x5], 4294967280 }
  0x7b   : > { %936 = dma.done.wait [#allocation3 + $0x6], 16 }
  0x7c   : > { %937 = vsyncadd [#allocation3 + $0x6], 4294967280 }
  0x7d   : > { %938 = dma.done.wait [#allocation3 + $0x7], 16 }
  0x7e   : > { %939 = vsyncadd [#allocation3 + $0x7], 4294967280  ;;  %s791_s4 = sshll.u32 %s958_s19, 7  ;;  %s562_s23 = sshll.u32 %s129_s10, 4  ;;  %v542_v8 = vld [vmem:[#allocation2] sm:$0xff]  ;;  %vm545_vm0 = vcmask 261120   ;;  %s1100_s23 = int_to_ptr.vmem [resolvable:$true] %s562_s23 }
  0x7f   : > { %v543_v9 = vld [vmem:[%s1151_s2] sm:$0xff]  ;;  %s1098_s8 = scalar_lea.hbm %s1152_s3, %s791_s4  ;;  %s548_s19 = scalar_lea.sflag [#allocation7], %s127_s30 }
  0x80   : > { %v544_v10 = vadd.f32 %v543_v9, %v542_v8  ;;  %s870_s9 = scalar_lea.vmem %s1100_s23, 128  ;;  %s969_s11 = smov [#allocation6]  }
  0x81   : > { %p871_p2 = scmp.ne.s32.totalorder %s1100_s23, %s870_s9  ;;  %s874_s12 = sshll.u32 %s969_s11, 4  ;;  %s875_s12 = int_to_ptr.vmem [resolvable:$false] %s874_s12 }
  0x82   : > { %546 = vst.msk [vmem:[%s129_s10] sm:$0xff] %vm545_vm0, %v544_v10  ;;  %s876_s13 = scalar_lea.vmem %s875_s12, 256  ;;  %p877_p5 = scmp.lt.s32.totalorder %s1100_s23, %s875_s12 }
  0x83   : > { %p872_p3 = pnand %p871_p2, %p1033_p9  ;;  %p878_p6 = scmp.lt.s32.totalorder %s876_s13, %s870_s9 }
  0x85   : > { %p873_p4 = pneg %p872_p3  ;;  %p879_p7 = por %p878_p6, %p877_p5 }
  0x87   : > { %p880_p8 = pnand %p879_p7, %p873_p4 }
  0x89   : > { %883 = shalt.err (!%p880_p8)
}
  0x8a   : > { %s884_s30 = scalar_lea.hbm %s1098_s8, 128  ;;  %s888_s14 = scalar_lea.hbm %s1152_s3, 256 }
  0x8b   : > { %p885_p10 = scmp.ne.s32.totalorder %s1098_s8, %s884_s30  ;;  %p889_p0 = scmp.lt.u32.totalorder %s1098_s8, %s1152_s3 }
  0x8c   : > { %p890_p1 = scmp.lt.u32.totalorder %s888_s14, %s884_s30  ;;  %p892_p3 = scmp.lt.u32.totalorder %s884_s30, %s1098_s8 }
  0x8d   : > { %p886_p11 = pnand %p885_p10, %p1033_p9 }
  0x8e   : > { %p891_p2 = por %p890_p1, %p889_p0 }
  0x8f   : > { %p887_p12 = pneg %p886_p11 }
  0x90   : > { %p893_p4 = por %p892_p3, %p891_p2 }
  0x92   : > { %p894_p5 = pnand %p893_p4, %p887_p12 }
  0x94   : > { %897 = shalt.err (!%p894_p5)
}
  0x95   : > { %802 = dma.vmem_to_hbm [thread:$0]  (%p1033_p9), %s1100_s23, 128, %s1098_s8, %s548_s19  }
  0x96 PF: > { %p808_p6 = scmp.ge.s32.totalorder %s966_s21, 2  ;;  %s574_s22 = sand.u32 1, %s946_s17  }
  0x97   : > { %s575_s4 = scalar_lea.sflag [#allocation7], %s574_s22 }
  0x98   : > { %p805_p7 = pnand %p808_p6, %p1040_p13 }
  0x9a   : > { %941 = dma.done.wait (!%p805_p7), %s575_s4, 128  }
  0x9b   : > { %943 = vsyncadd (!%p805_p7), %s575_s4, 4294967168  ;;  %s22_s21 = sadd.s32 1, %s966_s21   ;;  %s1155_s17 = smov %s950_s18 }
  0x9c   : > { %p19_p8 = scmp.ge.s32.totalorder %s22_s21, 4   ;;  %s1156_s18 = smov %s954_s0 }
  0x9d   : > { %s1157_s0 = smov %s1046_s29  ;;  %s1158_s19 = smov %s962_s20 }
  0x9e   : > { %s1159_s20 = smov %s1161_s24  ;;  %21 = sbr.rel (!%p19_p8) target bundleno = 19 (0x13), region = 408 }
  0xa5   :  { %580 = vsyncpa [#allocation7], 1 }
  0xa6   :  { %582 = vsyncpa [#allocation7 + $0x1], 1 }
  0xa7   :  { %583 = vsyncmov [#allocation3] }
  0xaa   :  { %s584_s26 = vpop.sfrf %583 }
  0xab   :  { %p794_p9 = scmp.ne.s32.totalorder %s584_s26, 0 }
  0xad   :  { %588 = shalt.err (%p794_p9)  }
  0xae   :  { %590 = vsyncmov [#allocation3 + $0x1] }
  0xb1   :  { %s591_s28 = vpop.sfrf %590 }
  0xb2   :  { %p795_p13 = scmp.ne.s32.totalorder %s591_s28, 0 }
  0xb4   :  { %595 = shalt.err (%p795_p13)  }
  0xb5   :  { %597 = vsyncmov [#allocation3 + $0x2] }
  0xb8   :  { %s598_s23 = vpop.sfrf %597 }
  0xb9   :  { %p796_p10 = scmp.ne.s32.totalorder %s598_s23, 0 }
  0xbb   :  { %602 = shalt.err (%p796_p10)  }
  0xbc   :  { %604 = vsyncmov [#allocation3 + $0x3] }
  0xbf   :  { %s605_s29 = vpop.sfrf %604 }
  0xc0   :  { %p797_p11 = scmp.ne.s32.totalorder %s605_s29, 0 }
  0xc2   :  { %609 = shalt.err (%p797_p11)  }
  0xc3   :  { %611 = vsyncmov [#allocation3 + $0x4] }
  0xc6   :  { %s612_s21 = vpop.sfrf %611 }
  0xc7   :  { %p798_p12 = scmp.ne.s32.totalorder %s612_s21, 0 }
  0xc9   :  { %616 = shalt.err (%p798_p12)  }
  0xca   :  { %618 = vsyncmov [#allocation3 + $0x5] }
  0xcd   :  { %s619_s1 = vpop.sfrf %618 }
  0xce   :  { %p799_p0 = scmp.ne.s32.totalorder %s619_s1, 0 }
  0xd0   :  { %623 = shalt.err (%p799_p0)  }
  0xd1   :  { %625 = vsyncmov [#allocation3 + $0x6] }
  0xd4   :  { %s626_s2 = vpop.sfrf %625 }
  0xd5   :  { %p800_p1 = scmp.ne.s32.totalorder %s626_s2, 0 }
  0xd7   :  { %630 = shalt.err (%p800_p1)  }
  0xd8   :  { %632 = vsyncmov [#allocation3 + $0x7] }
  0xdb   :  { %s633_s3 = vpop.sfrf %632 }
  0xdc   :  { %p801_p2 = scmp.ne.s32.totalorder %s633_s3, 0 }
  0xde   :  { %637 = shalt.err (%p801_p2)  }

</bundles_post_ra>
